<compile_context>
chip_gen: v5e
topology: v5e:2x2
jax: 0.10.0
libtpu: 0.0.40
codegen_flags: <defaults>
</compile_context>

<pallas_src>
import math
import jax
import jax.numpy as jnp
from jax.experimental import pallas as pl
from jax.experimental.pallas import tpu as pltpu


def _cdiv(a, b):
    return (a + b - 1) // b


def _round_up(a, b):
    return _cdiv(a, b) * b


def _pad_to(a, shape):
    return jnp.pad(a, [(0, t - s) for s, t in zip(a.shape, shape)])


def _decoder_kernel(x_ref, w1_ref, b1_ref, w2_ref, b2_ref, w3_ref, b3_ref, o_ref):
    x = x_ref[...]            # (tile_rows, dp) in storage dtype (f32 or bf16)
    dt = x.dtype

    # layer1: Linear + ReLU (Dropout = identity at inference).
    # MXU inputs in storage dtype, f32 accumulate; bias/ReLU in f32.
    h1 = jnp.dot(x, w1_ref[...], preferred_element_type=jnp.float32)
    h1 = jnp.maximum(h1 + b1_ref[...].astype(jnp.float32), 0.0)

    # layer2: Linear + ReLU
    h2 = jnp.dot(h1.astype(dt), w2_ref[...], preferred_element_type=jnp.float32)
    h2 = jnp.maximum(h2 + b2_ref[...].astype(jnp.float32), 0.0)

    # residual add in f32, cast back for the MXU, then output projection.
    r = (h2 + x.astype(jnp.float32)).astype(dt)
    out = jnp.dot(r, w3_ref[...], preferred_element_type=jnp.float32)
    out = out + b3_ref[...].astype(jnp.float32)

    o_ref[...] = out.astype(o_ref.dtype)


def residual_decoder(x, params, *, tile_rows=512, vmem_budget_bytes=24 << 20):
    """x: (B, S, d_model)  ->  (B, S, f_in).  Output dtype follows x.dtype."""
    w1, b1, w2, b2, w3, b3 = params
    B, S, d_model = x.shape
    f_in = w3.shape[1]
    M = B * S
    dt = x.dtype
    itemsize = jnp.dtype(dt).itemsize

    # --- lane-dense feature padding (multiples of 128) ---------------------
    dp = _round_up(d_model, 128)
    fp = _round_up(f_in, 128)

    w1p = _pad_to(w1.astype(dt), (dp, dp))
    w2p = _pad_to(w2.astype(dt), (dp, dp))
    w3p = _pad_to(w3.astype(dt), (dp, fp))
    b1p = _pad_to(b1.astype(jnp.float32), (1, dp))
    b2p = _pad_to(b2.astype(jnp.float32), (1, dp))
    b3p = _pad_to(b3.astype(jnp.float32), (1, fp))

    # --- pick row tile: large, multiple of 8, >=2 grid steps, fits VMEM ----
    tile_rows = max(8, min(_round_up(tile_rows, 8), _round_up(_cdiv(M, 2), 8)))

    weight_bytes = 2 * (2 * dp * dp + dp * fp) * itemsize + 2 * (2 * dp + fp) * 4

    def _row_tile_bytes(t):
        io = 2 * (t * dp + t * fp) * itemsize   # in/out tiles, double-buffered
        act = 3 * t * dp * 4                    # f32 intermediates (h1, h2, r)
        return io + act

    while tile_rows > 8 and weight_bytes + _row_tile_bytes(tile_rows) > vmem_budget_bytes:
        tile_rows = max(8, _round_up(tile_rows // 2, 8))
    # TODO(synk): if d_model is so large that the resident weights alone blow
    # the VMEM budget (esp. v7x 64 MiB), add a K-tiling grid axis over W1/W2
    # with an f32 accumulator scratch instead of shrinking tile_rows.

    # --- ragged rows: pad to a multiple of tile_rows, slice afterwards -----
    Mp = _round_up(M, tile_rows)
    x2d = _pad_to(x.reshape(M, d_model), (Mp, dp))

    flops = 2 * M * d_model * (2 * d_model + f_in)
    bytes_accessed = (M * (d_model + f_in) + 2 * d_model * d_model + d_model * f_in) * itemsize
    cost = pl.CostEstimate(flops=flops, transcendentals=0,
                           bytes_accessed=bytes_accessed)

    full = lambda i: (0, 0)   # weights/biases: same full block every grid step
    out2d = pl.pallas_call(
        _decoder_kernel,
        out_shape=jax.ShapeDtypeStruct((Mp, fp), dt),
        grid_spec=pltpu.PrefetchScalarGridSpec(
            num_scalar_prefetch=0,
            grid=(Mp // tile_rows,),
            in_specs=[
                pl.BlockSpec((tile_rows, dp), lambda i: (i, 0)),  # x rows
                pl.BlockSpec((dp, dp), full),                     # W1
                pl.BlockSpec((1, dp), full),                      # b1
                pl.BlockSpec((dp, dp), full),                     # W2
                pl.BlockSpec((1, dp), full),                      # b2
                pl.BlockSpec((dp, fp), full),                     # W3
                pl.BlockSpec((1, fp), full),                      # b3
            ],
            out_specs=pl.BlockSpec((tile_rows, fp), lambda i: (i, 0)),
        ),
        compiler_params=pltpu.CompilerParams(
            dimension_semantics=("parallel",)),
        cost_estimate=cost,
    )(x2d, w1p, b1p, w2p, b2p, w3p, b3p)

    return out2d[:M, :f_in].reshape(B, S, f_in)


def init_params(key, d_model, f_in, dtype=jnp.float32):
    """nn.Linear default init (uniform +/- 1/sqrt(fan_in)); weights stored (in, out)."""
    keys = jax.random.split(key, 6)

    def lin(kw, kb, fan_in, fan_out):
        bound = 1.0 / math.sqrt(fan_in)
        w = jax.random.uniform(kw, (fan_in, fan_out), dtype, -bound, bound)
        b = jax.random.uniform(kb, (1, fan_out), dtype, -bound, bound)
        return w, b

    w1, b1 = lin(keys[0], keys[1], d_model, d_model)
    w2, b2 = lin(keys[2], keys[3], d_model, d_model)
    w3, b3 = lin(keys[4], keys[5], d_model, f_in)
    return (w1, b1, w2, b2, w3, b3)


def _reference(x, params):
    w1, b1, w2, b2, w3, b3 = params
    h1 = jnp.maximum(x @ w1 + b1[0], 0.0)
    h2 = jnp.maximum(h1 @ w2 + b2[0], 0.0)
    return (h2 + x) @ w3 + b3[0]


if __name__ == "__main__":
    # shapes implied by the forward: (batch, seq, d_model) -> (batch, seq, f_in)
    B, S, d_model, f_in = 2, 8, 32, 4

    key = jax.random.PRNGKey(0)
    k_x, k_p = jax.random.split(key)
    x = jax.random.normal(k_x, (B, S, d_model), jnp.float32)
    params = init_params(k_p, d_model, f_in)
    ref = _reference(x, params)

    # f32 storage path (exact).
    out = jax.block_until_ready(residual_decoder(x, params))
    assert out.shape == (B, S, f_in)
    assert jnp.allclose(out, ref, atol=1e-4, rtol=1e-4)

    # bf16 storage / bf16 MXU inputs with f32 accumulation (fast path).
    out_bf16 = jax.block_until_ready(residual_decoder(x.astype(jnp.bfloat16), params))
    assert out_bf16.dtype == jnp.bfloat16
    assert jnp.allclose(out_bf16.astype(jnp.float32), ref, atol=1e-1, rtol=1e-1)

    # TODO(synk): dropout (p=0.1) is training-only stochastic masking; kernel
    # implements inference semantics (identity), matching model.eval().
    print("KERNEL_OK")
</pallas_src>

<mosaic_0001>
module attributes {stable_mosaic.version = 11 : i64} {
  func.func @_decoder_kernel(%arg0: i32, %arg1: memref<8x128xf32, #tpu.memory_space<vmem>>, %arg2: memref<128x128xf32, #tpu.memory_space<vmem>>, %arg3: memref<1x128xf32, #tpu.memory_space<vmem>>, %arg4: memref<128x128xf32, #tpu.memory_space<vmem>>, %arg5: memref<1x128xf32, #tpu.memory_space<vmem>>, %arg6: memref<128x128xf32, #tpu.memory_space<vmem>>, %arg7: memref<1x128xf32, #tpu.memory_space<vmem>>, %arg8: memref<8x128xf32, #tpu.memory_space<vmem>>) attributes {dimension_semantics = [#tpu.dimension_semantics<parallel>], iteration_bounds = array<i64: 2>, scalar_prefetch = 0 : i64, scratch_operands = 0 : i64, tpu.core_type = #tpu.core_type<tc>, window_params = [{transform_indices = @transform_0, window_bounds = array<i64: 8, 128>}, {pipeline_mode = #tpu.pipeline_mode<synchronous>, transform_indices = @transform_1, window_bounds = array<i64: 128, 128>}, {pipeline_mode = #tpu.pipeline_mode<synchronous>, transform_indices = @transform_2, window_bounds = array<i64: 1, 128>}, {pipeline_mode = #tpu.pipeline_mode<synchronous>, transform_indices = @transform_3, window_bounds = array<i64: 128, 128>}, {pipeline_mode = #tpu.pipeline_mode<synchronous>, transform_indices = @transform_4, window_bounds = array<i64: 1, 128>}, {pipeline_mode = #tpu.pipeline_mode<synchronous>, transform_indices = @transform_5, window_bounds = array<i64: 128, 128>}, {pipeline_mode = #tpu.pipeline_mode<synchronous>, transform_indices = @transform_6, window_bounds = array<i64: 1, 128>}, {transform_indices = @transform_7, window_bounds = array<i64: 8, 128>}]} {
    %c0 = arith.constant 0 : index
    %c0_0 = arith.constant 0 : index
    %0 = vector.load %arg1[%c0, %c0_0] : memref<8x128xf32, #tpu.memory_space<vmem>>, vector<8x128xf32>
    %c0_1 = arith.constant 0 : index
    %c0_2 = arith.constant 0 : index
    %1 = vector.load %arg2[%c0_1, %c0_2] : memref<128x128xf32, #tpu.memory_space<vmem>>, vector<128x128xf32>
    %cst = arith.constant dense<0.000000e+00> : vector<8x128xf32>
    %2 = tpu.matmul %0, %1, %cst {dimension_numbers = #tpu.dot_dimension_numbers<[1], [0], [0], [1], [0, 0, 1, 1], [], []>} : vector<8x128xf32>, vector<128x128xf32>, vector<8x128xf32> -> vector<8x128xf32>
    %c0_3 = arith.constant 0 : index
    %c0_4 = arith.constant 0 : index
    %3 = vector.load %arg3[%c0_3, %c0_4] : memref<1x128xf32, #tpu.memory_space<vmem>>, vector<1x128xf32>
    %4 = vector.broadcast %3 : vector<1x128xf32> to vector<8x128xf32>
    %5 = arith.addf %2, %4 : vector<8x128xf32>
    %cst_5 = arith.constant 0.000000e+00 : f32
    %6 = vector.broadcast %cst_5 : f32 to vector<8x128xf32>
    %7 = arith.maximumf %5, %6 : vector<8x128xf32>
    %c0_6 = arith.constant 0 : index
    %c0_7 = arith.constant 0 : index
    %8 = vector.load %arg4[%c0_6, %c0_7] : memref<128x128xf32, #tpu.memory_space<vmem>>, vector<128x128xf32>
    %cst_8 = arith.constant dense<0.000000e+00> : vector<8x128xf32>
    %9 = tpu.matmul %7, %8, %cst_8 {dimension_numbers = #tpu.dot_dimension_numbers<[1], [0], [0], [1], [0, 0, 1, 1], [], []>} : vector<8x128xf32>, vector<128x128xf32>, vector<8x128xf32> -> vector<8x128xf32>
    %c0_9 = arith.constant 0 : index
    %c0_10 = arith.constant 0 : index
    %10 = vector.load %arg5[%c0_9, %c0_10] : memref<1x128xf32, #tpu.memory_space<vmem>>, vector<1x128xf32>
    %11 = vector.broadcast %10 : vector<1x128xf32> to vector<8x128xf32>
    %12 = arith.addf %9, %11 : vector<8x128xf32>
    %cst_11 = arith.constant 0.000000e+00 : f32
    %13 = vector.broadcast %cst_11 : f32 to vector<8x128xf32>
    %14 = arith.maximumf %12, %13 : vector<8x128xf32>
    %15 = arith.addf %14, %0 : vector<8x128xf32>
    %c0_12 = arith.constant 0 : index
    %c0_13 = arith.constant 0 : index
    %16 = vector.load %arg6[%c0_12, %c0_13] : memref<128x128xf32, #tpu.memory_space<vmem>>, vector<128x128xf32>
    %cst_14 = arith.constant dense<0.000000e+00> : vector<8x128xf32>
    %17 = tpu.matmul %15, %16, %cst_14 {dimension_numbers = #tpu.dot_dimension_numbers<[1], [0], [0], [1], [0, 0, 1, 1], [], []>} : vector<8x128xf32>, vector<128x128xf32>, vector<8x128xf32> -> vector<8x128xf32>
    %c0_15 = arith.constant 0 : index
    %c0_16 = arith.constant 0 : index
    %18 = vector.load %arg7[%c0_15, %c0_16] : memref<1x128xf32, #tpu.memory_space<vmem>>, vector<1x128xf32>
    %19 = vector.broadcast %18 : vector<1x128xf32> to vector<8x128xf32>
    %20 = arith.addf %17, %19 : vector<8x128xf32>
    %c0_17 = arith.constant 0 : index
    %c0_18 = arith.constant 0 : index
    %21 = vector.load %arg8[%c0_17, %c0_18] : memref<8x128xf32, #tpu.memory_space<vmem>>, vector<8x128xf32>
    tpu.vector_store %arg8[%c0_17, %c0_18], %20 {strides = array<i32>} : memref<8x128xf32, #tpu.memory_space<vmem>>, vector<8x128xf32>,
    return
  }
  func.func @transform_0(%arg0: i32) -> (i32, i32) {
    %c0_i32 = arith.constant 0 : i32
    %c0_i32_0 = arith.constant 0 : i32
    return %arg0, %c0_i32 : i32, i32
  }
  func.func @transform_1(%arg0: i32) -> (i32, i32) {
    %c0_i32 = arith.constant 0 : i32
    %c0_i32_0 = arith.constant 0 : i32
    %c0_i32_1 = arith.constant 0 : i32
    return %c0_i32, %c0_i32_0 : i32, i32
  }
  func.func @transform_2(%arg0: i32) -> (i32, i32) {
    %c0_i32 = arith.constant 0 : i32
    %c0_i32_0 = arith.constant 0 : i32
    %c0_i32_1 = arith.constant 0 : i32
    return %c0_i32, %c0_i32_0 : i32, i32
  }
  func.func @transform_3(%arg0: i32) -> (i32, i32) {
    %c0_i32 = arith.constant 0 : i32
    %c0_i32_0 = arith.constant 0 : i32
    %c0_i32_1 = arith.constant 0 : i32
    return %c0_i32, %c0_i32_0 : i32, i32
  }
  func.func @transform_4(%arg0: i32) -> (i32, i32) {
    %c0_i32 = arith.constant 0 : i32
    %c0_i32_0 = arith.constant 0 : i32
    %c0_i32_1 = arith.constant 0 : i32
    return %c0_i32, %c0_i32_0 : i32, i32
  }
  func.func @transform_5(%arg0: i32) -> (i32, i32) {
    %c0_i32 = arith.constant 0 : i32
    %c0_i32_0 = arith.constant 0 : i32
    %c0_i32_1 = arith.constant 0 : i32
    return %c0_i32, %c0_i32_0 : i32, i32
  }
  func.func @transform_6(%arg0: i32) -> (i32, i32) {
    %c0_i32 = arith.constant 0 : i32
    %c0_i32_0 = arith.constant 0 : i32
    %c0_i32_1 = arith.constant 0 : i32
    return %c0_i32, %c0_i32_0 : i32, i32
  }
  func.func @transform_7(%arg0: i32) -> (i32, i32) {
    %c0_i32 = arith.constant 0 : i32
    %c0_i32_0 = arith.constant 0 : i32
    return %arg0, %c0_i32 : i32, i32
  }
}

</mosaic_0001>

<bundles_post_ra>
// kernel: tpu_custom_call.1
= control target key start
LH: loop header
LB: loop body
LE: loop exit
PB: predicated region body
PF: predicated region fallthrough
CT: control target
= control target key end

     0   :  { %s1099_s0 = inlined_call_operand.hbm [shape: f32[16,128], index: 0, kind: input, shape index: {}]   ;;  %s1100_s1 = inlined_call_operand.hbm [shape: f32[128,128], index: 1, kind: input, shape index: {}]   ;;  %s1101_s2 = inlined_call_operand.vmem [shape: f32[1,128], index: 2, kind: input, shape index: {}]   ;;  %s1102_s3 = inlined_call_operand.hbm [shape: f32[128,128], index: 3, kind: input, shape index: {}]   ;;  %s1103_s4 = inlined_call_operand.vmem [shape: f32[1,128], index: 4, kind: input, shape index: {}]   ;;  %s1104_s5 = inlined_call_operand.hbm [shape: f32[128,128], index: 5, kind: input, shape index: {}]   ;;  %s1105_s6 = inlined_call_operand.vmem [shape: f32[1,128], index: 6, kind: input, shape index: {}]   ;;  %s1106_s7 = inlined_call_operand.hbm [shape: f32[16,128], index: 7, kind: output, shape index: {}]  }
   0x1   :  { %1107 = sst [smem:[#allocation15_spill]] %s1100_s1 }
   0x2   :  { %12 = vsyncpa [#allocation3], 0 }
   0x3   :  { %14 = vsyncpa [#allocation3 + $0x1], 0 }
   0x4   :  { %15 = vsyncpa [#allocation6], 0 }
   0x5   :  { %16 = vsyncpa [#allocation9], 0 }
   0x6   :  { %17 = vsyncpa [#allocation4], 0 }
   0x7   :  { %19 = vsyncpa [#allocation4 + $0x1], 0  ;;  %s927_s24 = smov 0   ;;  %s929_s25 = smov 0  }
   0x8   :  { %s931_s26 = smov 0   ;;  %s933_s27 = smov 0  }
   0x9 LB: > { %s1108_s1 = sld [smem:[#allocation15_spill]]  ;;  %s951_s8 = sadd.s32 4294967295, %s880_s27   ;;  %s880_s27 = sphi %s933_s27, %s1119_s27   ;;  %s876_s26 = sphi %s931_s26, %s1118_s26   ;;  %s872_s25 = sphi %s929_s25, %s1117_s25   ;;  %s868_s24 = sphi %s927_s24, %s1116_s24  }
   0xa   : > { %p587_p0 = scmp.ge.s32.totalorder %s880_s27, 1  ;;  %p46_p1 = scmp.eq.s32.totalorder %s951_s8, 0 }
   0xb   : > { %p208_p2 = scmp.lt.s32.totalorder %s880_s27, 3  ;;  %s882_s10 = smov [#allocation5]  }
   0xc   : > { %s221_s11 = sshll.u32 %s882_s10, 4  ;;  %s236_s14 = sshll.u32 %s1102_s3, 4  ;;  %s222_s11 = int_to_ptr.vmem [resolvable:$true] %s221_s11  ;;  %s237_s14 = int_to_ptr.hbm [resolvable:$true] %s236_s14 }
   0xd   : > { %p956_p3 = pnand %p587_p0, %p208_p2  ;;  %s253_s18 = sshll.u32 %s1104_s5, 4  ;;  %s254_s18 = int_to_ptr.hbm [resolvable:$true] %s253_s18 }
   0xe   : > { %s883_s19 = smov [#allocation7]   ;;  %s884_s21 = smov 128  }
   0xf   : > { %s219_s30 = sshll.u32 %s1108_s1, 4  ;;  %p620_p4 = pneg %p956_p3  ;;  %s220_s30 = int_to_ptr.hbm [resolvable:$true] %s219_s30 }
  0x10   : > { %s238_s20 = sshll.u32 %s883_s19, 4  ;;  %s885_s22 = smov 8   ;;  %s239_s20 = int_to_ptr.vmem [resolvable:$true] %s238_s20 }
  0x11   : > { %p968_p6 = pnand %p620_p4, %p46_p1  ;;  %s886_s23 = smov [#allocation8]  }
  0x12   : > { %s255_s28 = sshll.u32 %s886_s23, 4  ;;  %s586_s29 = sadd.s32 4294967294, %s880_s27   ;;  %s256_s28 = int_to_ptr.vmem [resolvable:$true] %s255_s28 }
  0x13   : > { %623 = dma.hbm_to_vmem [thread:$0]  (!%p968_p6), %s220_s30, 2048, %s222_s11, [#allocation6], %s884_s21, %s884_s21, %s885_s22  }
  0x14   : > { %626 = dma.hbm_to_vmem [thread:$0]  (!%p968_p6), %s237_s14, 2048, %s239_s20, [#allocation6], %s884_s21, %s884_s21, %s885_s22  }
  0x15   : > { %629 = dma.hbm_to_vmem [thread:$0]  (!%p968_p6), %s254_s18, 2048, %s256_s28, [#allocation9], %s884_s21, %s884_s21, %s885_s22  }
  0x16   : > { %s983_s10 = sadd.s32 1, %s880_s27   ;;  %s32_s12 = sadd.s32 1, %s876_s26 }
  0x17   : > { %s29_s30 = ssub.s32 %s880_s27, %s983_s10  ;;  %p39_p7 = scmp.ne.s32.totalorder %s876_s26, %s872_s25 }
  0x18   : > { %p30_p8 = scmp.eq.s32.totalorder %s29_s30, 0  ;;  %p40_p9 = scmp.eq.s32.totalorder %s880_s27, 0 }
  0x19   : > { %p45_p10 = scmp.ne.s32.totalorder %s872_s25, %s868_s24  ;;  %p195_p11 = scmp.eq.s32.totalorder %s951_s8, 1 }
  0x1a   : > { %s995_s11 = scalar_select %p30_p8, %s876_s26, %s32_s12  }
  0x1b   : > { %p999_p12 = por %p46_p1, %p45_p10  ;;  %p1003_p13 = por %p195_p11, %p39_p7 }
  0x1c   : > { %p201_p0 = scmp.eq.s32.totalorder %s586_s29, 1  ;;  %p41_p2 = por %p40_p9, %p39_p7 }
  0x1d   : > { %s272_s15 = sand.u32 1, %s876_s26   ;;  %p641_p6 = scmp.lt.s32.totalorder %s880_s27, 2 }
  0x1e   : > { %p1008_p4 = por %p201_p0, %p45_p10  ;;  %s592_s17 = sshll.u32 %s272_s15, 3 }
  0x1f   : > { %s593_s18 = sshll.u32 %s880_s27, 3  ;;  %s276_s23 = scalar_lea.vmem [#allocation2], %s592_s17 }
  0x20   : > { %s280_s21 = scalar_lea.hbm %s1099_s0, %s593_s18  ;;  %s284_s28 = sshll.u32 %s276_s23, 4  ;;  %s285_s28 = int_to_ptr.vmem [resolvable:$true] %s284_s28 }
  0x21   : > { %s282_s22 = sshll.u32 %s280_s21, 4  ;;  %p1017_p8 = pnand %p641_p6, %p41_p2  ;;  %s283_s22 = int_to_ptr.hbm [resolvable:$true] %s282_s22 }
  0x22   : > { %s273_s12 = scalar_lea.sflag [#allocation3], %s272_s15  ;;  %s776_s30 = sshra.s32 %s283_s22, 4  ;;  %s777_s30 = int_to_ptr.hbm [resolvable:$true] %s776_s30 }
  0x23   : > { %s778_s1 = scalar_lea.hbm %s777_s30, 8  ;;  %p780_p9 = pneg %p1017_p8 }
  0x24   : > { %p779_p7 = scmp.ne.s32.totalorder %s777_s30, %s778_s1  ;;  %s783_s17 = scalar_lea.hbm %s1099_s0, 16 }
  0x25   : > { %p784_p0 = scmp.lt.s32.totalorder %s777_s30, %s1099_s0  ;;  %p785_p2 = scmp.lt.s32.totalorder %s783_s17, %s778_s1 }
  0x26   : > { %p781_p10 = pnand %p780_p9, %p779_p7 }
  0x27   : > { %p786_p6 = por %p785_p2, %p784_p0 }
  0x28   : > { %p782_p11 = pneg %p781_p10 }
  0x2a   : > { %p787_p5 = pnand %p786_p6, %p782_p11 }
  0x2c   : > { %790 = shalt.err (!%p787_p5)
}
  0x2d   : > { %633 = dma.hbm_to_vmem [thread:$0]  (!%p1017_p8), %s283_s22, 128, %s285_s28, %s273_s12  }
  0x2e   : > { %293 = sbr.rel (%p956_p3) target bundleno = 487 (0x1e7), region = 48  ;;  %s1034_s15 = sand.u32 (!%p956_p3), 1, %s872_s25  }
  0x2f   : > { %s595_s23 = sshll.u32 (!%p956_p3), %s1034_s15, 3  ;;  %s296_s18 = scalar_lea.sflag (!%p956_p3), [#allocation3], %s1034_s15 }
  0x30   : > { %s1040_s1 = scalar_lea.vmem (!%p956_p3), [#allocation2], %s595_s23 }
  0x33   : > { %851 = dma.done.wait (%p999_p12), %s296_s18, 128  }
  0x34   : > { %853 = vsyncadd (%p999_p12), %s296_s18, 4294967168 }
  0x35   : > { %855 = dma.done.wait (%p46_p1), [#allocation6], 4096  }
  0x36   : > { %857 = vsyncadd (%p46_p1), [#allocation6], 4294963200 }
  0x37   : > { %859 = dma.done.wait (%p46_p1), [#allocation9], 2048  }
  0x38   : > { %861 = vsyncadd (%p46_p1), [#allocation9], 4294965248  ;;  %v362_v0 = vld [vmem:[#allocation5 + $0x78] sm:$0xff]  ;;  %v361_v1 = vld [vmem:[#allocation5 + $0x70] sm:$0xff]  ;;  %s601_s29 = sshll.u32 %s951_s8, 3  ;;  %s345_s21 = scalar_lea.vmem [#allocation10], %s595_s23 }
  0x39   : > { %367 = vmatpush.msra.mxu0 %v362_v0  ;;  %v360_v2 = vld [vmem:[#allocation5 + $0x68] sm:$0xff]  ;;  %v359_v3 = vld [vmem:[#allocation5 + $0x60] sm:$0xff]  ;;  %v403_v4 = vld [vmem:[#allocation7 + $0x78] sm:$0xff]  ;;  %s482_s19 = scalar_lea.hbm %s1106_s7, %s601_s29  ;;  %s484_s18 = sshll.u32 %s345_s21, 4  ;;  %s485_s18 = int_to_ptr.vmem [resolvable:$true] %s484_s18 }
  0x3a   : > { %v358_v5 = vld [vmem:[#allocation5 + $0x58] sm:$0xff]  ;;  %408 = vmatpush.msra.mxu1 %v403_v4  ;;  %v402_v6 = vld [vmem:[#allocation7 + $0x70] sm:$0xff]  ;;  %v401_v7 = vld [vmem:[#allocation7 + $0x68] sm:$0xff]  ;;  %s472_s9 = scalar_lea.sflag [#allocation4], %s1034_s15  ;;  %s826_s29 = scalar_lea.hbm %s1106_s7, 16 }
  0x3b   : > { %368 = vmatpush.msra.mxu0 %v361_v1  ;;  %v357_v8 = vld [vmem:[#allocation5 + $0x50] sm:$0xff]  ;;  %v400_v9 = vld [vmem:[#allocation7 + $0x60] sm:$0xff]  ;;  %v356_v10 = vld [vmem:[#allocation5 + $0x48] sm:$0xff] }
  0x3c   : > { %409 = vmatpush.msra.mxu1 %v402_v6  ;;  %v399_v11 = vld [vmem:[#allocation7 + $0x58] sm:$0xff]  ;;  %v355_v12 = vld [vmem:[#allocation5 + $0x40] sm:$0xff]  ;;  %v398_v13 = vld [vmem:[#allocation7 + $0x50] sm:$0xff] }
  0x3d   : > { %369 = vmatpush.msra.mxu0 %v360_v2  ;;  %v354_v14 = vld [vmem:[#allocation5 + $0x38] sm:$0xff]  ;;  %v397_v15 = vld [vmem:[#allocation7 + $0x48] sm:$0xff]  ;;  %v353_v16 = vld [vmem:[#allocation5 + $0x30] sm:$0xff] }
  0x3e   : > { %410 = vmatpush.msra.mxu1 %v401_v7  ;;  %v396_v17 = vld [vmem:[#allocation7 + $0x40] sm:$0xff]  ;;  %v352_v18 = vld [vmem:[#allocation5 + $0x28] sm:$0xff]  ;;  %v395_v19 = vld [vmem:[#allocation7 + $0x38] sm:$0xff] }
  0x3f   : > { %370 = vmatpush.msra.mxu0 %v359_v3  ;;  %v351_v20 = vld [vmem:[#allocation5 + $0x20] sm:$0xff]  ;;  %v394_v21 = vld [vmem:[#allocation7 + $0x30] sm:$0xff]  ;;  %v350_v22 = vld [vmem:[#allocation5 + $0x18] sm:$0xff] }
  0x40   : > { %411 = vmatpush.msra.mxu1 %v400_v9  ;;  %v393_v23 = vld [vmem:[#allocation7 + $0x28] sm:$0xff]  ;;  %v349_v24 = vld [vmem:[#allocation5 + $0x10] sm:$0xff]  ;;  %v392_v25 = vld [vmem:[#allocation7 + $0x20] sm:$0xff] }
  0x41   : > { %371 = vmatpush.msra.mxu0 %v358_v5  ;;  %v348_v26 = vld [vmem:[#allocation5 + $0x8] sm:$0xff]  ;;  %v391_v27 = vld [vmem:[#allocation7 + $0x18] sm:$0xff]  ;;  %v347_v28 = vld [vmem:[#allocation5] sm:$0xff] }
  0x42   : > { %412 = vmatpush.msra.mxu1 %v399_v11  ;;  %v346_v29 = vld [vmem:[%s1040_s1] sm:$0xff]  ;;  %v389_v31 = vld [vmem:[#allocation7 + $0x8] sm:$0xff]  ;;  %v388_v32 = vld [vmem:[#allocation7] sm:$0xff]  ;;  %s486_s1 = sshll.u32 %s482_s19, 4  ;;  %s487_s1 = int_to_ptr.hbm [resolvable:$true] %s486_s1 }
  0x43   : > { %372 = vmatpush.msra.mxu0 %v357_v8  ;;  %v390_v30 = vld [vmem:[#allocation7 + $0x10] sm:$0xff]  ;;  %v445_v33 = vld [vmem:[#allocation8 + $0x78] sm:$0xff]  ;;  %v443_v35 = vld [vmem:[#allocation8 + $0x68] sm:$0xff]  ;;  %s820_s8 = sshra.s32 %s487_s1, 4  ;;  %s821_s8 = int_to_ptr.hbm [resolvable:$true] %s820_s8 }
  0x44   : > { %413 = vmatpush.msra.mxu1 %v398_v13  ;;  %v444_v34 = vld [vmem:[#allocation8 + $0x70] sm:$0xff]  ;;  %450 = vmatpush.msra.mxu2 %v445_v33  ;;  %v442_v36 = vld [vmem:[#allocation8 + $0x60] sm:$0xff]  ;;  %v441_v37 = vld [vmem:[#allocation8 + $0x58] sm:$0xff]  ;;  %s822_s13 = scalar_lea.hbm %s821_s8, 8  ;;  %p827_p12 = scmp.lt.s32.totalorder %s821_s8, %s1106_s7 }
  0x45   : > { %373 = vmatpush.msra.mxu0 %v356_v10  ;;  %v440_v38 = vld [vmem:[#allocation8 + $0x50] sm:$0xff]  ;;  %v439_v39 = vld [vmem:[#allocation8 + $0x48] sm:$0xff]  ;;  %v438_v40 = vld [vmem:[#allocation8 + $0x40] sm:$0xff]  ;;  %p823_p1 = scmp.ne.s32.totalorder %s821_s8, %s822_s13  ;;  %p828_p8 = scmp.lt.s32.totalorder %s826_s29, %s822_s13 }
  0x46   : > { %414 = vmatpush.msra.mxu1 %v397_v15  ;;  %451 = vmatpush.msra.mxu2 %v444_v34  ;;  %v437_v41 = vld [vmem:[#allocation8 + $0x38] sm:$0xff]  ;;  %v436_v42 = vld [vmem:[#allocation8 + $0x30] sm:$0xff]  ;;  %v435_v43 = vld [vmem:[#allocation8 + $0x28] sm:$0xff] }
  0x47   : > { %374 = vmatpush.msra.mxu0 %v355_v12  ;;  %v434_v44 = vld [vmem:[#allocation8 + $0x20] sm:$0xff]  ;;  %v683_v45 = vld [vmem:[%s1101_s2] ss:$0 sm:$0xff]  ;;  %v433_v49 = vld [vmem:[#allocation8 + $0x18] sm:$0xff]  ;;  %p824_p3 = pnand %p823_p1, %p1003_p13  ;;  %p829_p7 = por %p828_p8, %p827_p12 }
  0x48   : > { %415 = vmatpush.msra.mxu1 %v396_v17  ;;  %452 = vmatpush.msra.mxu2 %v443_v35  ;;  %v432_v50 = vld [vmem:[#allocation8 + $0x10] sm:$0xff]  ;;  %v431_v51 = vld [vmem:[#allocation8 + $0x8] sm:$0xff]  ;;  %v430_v52 = vld [vmem:[#allocation8] sm:$0xff] }
  0x49   : > { %375 = vmatpush.msra.mxu0 %v354_v14  ;;  %v684_v53 = vld [vmem:[%s1103_s4] ss:$0 sm:$0xff]  ;;  %p825_p5 = pneg %p824_p3 }
  0x4a   : > { %416 = vmatpush.msra.mxu1 %v395_v19  ;;  %453 = vmatpush.msra.mxu2 %v442_v36  ;;  %v685_v58 = vld [vmem:[%s1105_s6] ss:$0 sm:$0xff] }
  0x4b   : > { %376 = vmatpush.msra.mxu0 %v353_v16  ;;  %p830_p9 = pnand %p829_p7, %p825_p5 }
  0x4c   : > { %417 = vmatpush.msra.mxu1 %v394_v21  ;;  %454 = vmatpush.msra.mxu2 %v441_v37 }
  0x4d   : > { %377 = vmatpush.msra.mxu0 %v352_v18 }
  0x4e   : > { %418 = vmatpush.msra.mxu1 %v393_v23  ;;  %455 = vmatpush.msra.mxu2 %v440_v38 }
  0x4f   : > { %378 = vmatpush.msra.mxu0 %v351_v20 }
  0x50   : > { %419 = vmatpush.msra.mxu1 %v392_v25  ;;  %456 = vmatpush.msra.mxu2 %v439_v39 }
  0x51   : > { %379 = vmatpush.msra.mxu0 %v350_v22 }
  0x52   : > { %420 = vmatpush.msra.mxu1 %v391_v27  ;;  %457 = vmatpush.msra.mxu2 %v438_v40 }
  0x53   : > { %380 = vmatpush.msra.mxu0 %v349_v24 }
  0x54   : > { %421 = vmatpush.msra.mxu1 %v390_v30  ;;  %458 = vmatpush.msra.mxu2 %v437_v41 }
  0x55   : > { %381 = vmatpush.msra.mxu0 %v348_v26 }
  0x56   : > { %422 = vmatpush.msra.mxu1 %v389_v31  ;;  %459 = vmatpush.msra.mxu2 %v436_v42 }
  0x57   : > { %382 = vmatpush.msra.mxu0 %v347_v28 }
  0x58   : > { %383 = vmatmul.f32.vlgmr.msra.gmra.mxu0 %v346_v29  ;;  %423 = vmatpush.msra.mxu1 %v388_v32 }
  0x59   : > { %460 = vmatpush.msra.mxu2 %v435_v43 }
  0x5b   : > { %461 = vmatpush.msra.mxu2 %v434_v44 }
  0x5d   : > { %462 = vmatpush.msra.mxu2 %v433_v49 }
  0x5f   : > { %463 = vmatpush.msra.mxu2 %v432_v50 }
  0x61   : > { %464 = vmatpush.msra.mxu2 %v431_v51 }
  0x63   : > { %465 = vmatpush.msra.mxu2 %v430_v52 }
  0xd5   : > { %v384_v46 = vpop.f32.mrf.mxu0 }
  0xd6   : > { %v385_v47 = vadd.f32 %v683_v45, %v384_v46 }
  0xd8   : > { %v387_v48 = vmax.f32 %v385_v47, 0.0 }
  0xda   : > { %424 = vmatmul.f32.vlgmr.msra.gmra.mxu1 %v387_v48 }
 0x157   : > { %v425_v54 = vpop.f32.mrf.mxu1 }
 0x158   : > { %v426_v55 = vadd.f32 %v684_v53, %v425_v54 }
 0x15a   : > { %v428_v56 = vmax.f32 %v426_v55, 0.0 }
 0x15c   : > { %v429_v57 = vadd.f32 %v428_v56, %v346_v29 }
 0x15e   : > { %466 = vmatmul.f32.vlgmr.msra.gmra.mxu2 %v429_v57 }
 0x1e1   : > { %v467_v59 = vpop.f32.mrf.mxu2 }
 0x1e2   : > { %v468_v60 = vadd.f32 %v685_v58, %v467_v59 }
 0x1e4   : > { %470 = vst [vmem:[%s345_s21] sm:$0xff] %v468_v60 }
 0x1e5   : > { %833 = shalt.err (!%p830_p9)
}
 0x1e6   : > { %618 = dma.vmem_to_hbm [thread:$0]  (%p1003_p13), %s485_s18, 128, %s487_s1, %s472_s9  }
 0x1e7 PF: > { %s498_s15 = sand.u32 1, %s868_s24   ;;  %p1115_p10 = scmp.ge.s32.totalorder %s880_s27, 2 }
 0x1e8   : > { %s499_s30 = scalar_lea.sflag [#allocation4], %s498_s15 }
 0x1e9   : > { %p635_p11 = pnand %p1115_p10, %p1008_p4 }
 0x1eb   : > { %p636_p0 = pneg %p635_p11 }
 0x1ed   : > { %863 = dma.done.wait (%p636_p0), %s499_s30, 128  }
 0x1ee   : > { %865 = vsyncadd (%p636_p0), %s499_s30, 4294967168  ;;  %p22_p2 = scmp.ge.s32.totalorder %s983_s10, 4   ;;  %s1116_s24 = smov %s872_s25 }
 0x1ef   : > { %s1117_s25 = smov %s876_s26  ;;  %s1118_s26 = smov %s995_s11 }
 0x1f0   : > { %s1119_s27 = smov %s983_s10  ;;  %24 = sbr.rel (!%p22_p2) target bundleno = 9 (0x9), region = 105 }
 0x1f5   :  { %505 = vsyncpa [#allocation3], 1 }
 0x1f6   :  { %507 = vsyncpa [#allocation3 + $0x1], 1 }
 0x1f7   :  { %508 = vsyncpa [#allocation6], 1 }
 0x1f8   :  { %509 = vsyncpa [#allocation9], 1 }
 0x1f9   :  { %510 = vsyncpa [#allocation4], 1 }
 0x1fa   :  { %512 = vsyncpa [#allocation4 + $0x1], 1 }

</bundles_post_ra>
